<compile_context>
chip_gen: v6e
topology: v6e:2x2x1
jax: 0.10.0
libtpu: 0.0.40
codegen_flags: <defaults>
</compile_context>

<pallas_src>
import functools

import jax
import jax.numpy as jnp
from jax.experimental import pallas as pl
from jax.experimental.pallas import tpu as pltpu

# 2 input + 2 output pipeline buffers of the x block must fit this budget;
# chosen so the plan is valid on v7x (64 MiB physical VMEM) as well as
# v5e/v6e (128 MiB).
_VMEM_BUDGET_BYTES = 48 * 1024 * 1024
_LANE = 128


def _round_up(v, m):
    return ((v + m - 1) // m) * m


def _pad_axis(a, axis, target):
    pad = target - a.shape[axis]
    if pad == 0:
        return a
    widths = [(0, 0)] * a.ndim
    widths[axis] = (0, pad)
    return jnp.pad(a, widths)


def _ese_fused_kernel(x_ref, wt_ref, b_ref, o_ref, *, inv_hw):
    # x_ref : (NB, C, HWp) -- NB batch elements, spatial on the lane axis.
    # wt_ref: (C, C)       -- 1x1 conv weight, pre-transposed to (in, out).
    # b_ref : (1, C)       -- conv bias.
    x = x_ref[...]
    # Global average pool: f32 accumulation, divide by the *unpadded* H*W
    # (padded lanes are zero, so they do not perturb the sum).
    pooled = jnp.sum(x, axis=2, dtype=jnp.float32) * inv_hw              # (NB, C)
    s = jnp.dot(pooled, wt_ref[...], preferred_element_type=jnp.float32)
    s = s + b_ref[...].astype(jnp.float32)                               # (NB, C)
    gate = jax.nn.sigmoid(s).astype(o_ref.dtype)                         # (NB, C)
    # Per-channel gate broadcast over the spatial (lane) axis; no f32 copy of
    # the full block is materialized.
    o_ref[...] = x * gate[:, :, None]


def _ese_scale_kernel(x_ref, g_ref, o_ref):
    # Fallback streaming scale.  x_ref: (1, C, THW), g_ref: (1, C).
    o_ref[...] = x_ref[...] * g_ref[...][:, :, None]


def _invariant_spec(shape, single_buffer):
    index_map = lambda i: (0,) * len(shape)
    if single_buffer:
        # Tile never changes across the grid -> a single VMEM buffer suffices.
        return pl.BlockSpec(shape, index_map,
                            pipeline_mode=pl.Buffered(buffer_count=1))
    return pl.BlockSpec(shape, index_map)


def _ese_single_pass(x_flat, wt, b, *, nb, hw, vmem_limit, single_buffer_weights):
    n_pad, c, hwp = x_flat.shape
    kernel = functools.partial(_ese_fused_kernel, inv_hw=1.0 / hw)
    return pl.pallas_call(
        kernel,
        out_shape=jax.ShapeDtypeStruct((n_pad, c, hwp), x_flat.dtype),
        grid_spec=pltpu.PrefetchScalarGridSpec(
            num_scalar_prefetch=0,
            grid=(n_pad // nb,),
            in_specs=[
                pl.BlockSpec((nb, c, hwp), lambda i: (i, 0, 0)),
                _invariant_spec((c, c), single_buffer_weights),
                _invariant_spec((1, c), single_buffer_weights),
            ],
            out_specs=pl.BlockSpec((nb, c, hwp), lambda i: (i, 0, 0)),
        ),
        compiler_params=pltpu.CompilerParams(
            dimension_semantics=("parallel",),
            vmem_limit_bytes=vmem_limit,
        ),
    )(x_flat, wt, b)


def _ese_two_pass_scale(x_flat, gate, *, thw, vmem_limit):
    n, c, hwp = x_flat.shape
    return pl.pallas_call(
        _ese_scale_kernel,
        out_shape=jax.ShapeDtypeStruct((n, c, hwp), x_flat.dtype),
        grid_spec=pltpu.PrefetchScalarGridSpec(
            num_scalar_prefetch=0,
            grid=(n, hwp // thw),
            in_specs=[
                pl.BlockSpec((1, c, thw), lambda i, j: (i, 0, j)),
                pl.BlockSpec((1, c), lambda i, j: (i, 0)),
            ],
            out_specs=pl.BlockSpec((1, c, thw), lambda i, j: (i, 0, j)),
        ),
        compiler_params=pltpu.CompilerParams(
            dimension_semantics=("parallel", "parallel"),
            vmem_limit_bytes=vmem_limit,
        ),
    )(x_flat, gate)


def ese_module(x, weight, bias):
    """ESEModule forward.  x: (N, C, H, W); weight: (C, C, 1, 1); bias: (C,)."""
    n, c, h, w = x.shape
    hw = h * w
    hwp = _round_up(hw, _LANE)            # lane-dense last dim
    itemsize = x.dtype.itemsize

    wt = weight.reshape(c, c).T           # (C_in, C_out): pooled @ wt == conv1x1
    b = bias.reshape(1, c)

    x_flat = _pad_axis(x.reshape(n, c, hw), 2, hwp)

    invariant_bytes = c * c * 4 + c * 4        # weight + bias (single buffer)
    per_batch_bytes = c * hwp * itemsize       # one batch element's slab
    max_nb = (_VMEM_BUDGET_BYTES - invariant_bytes) // (4 * per_batch_bytes)

    if max_nb >= 1:
        # ---- single pass: read x once, write once --------------------------
        nb = int(min(max_nb, n))
        # Keep a few grid steps so the next slab's DMA overlaps the current
        # multiply (only shrink the batch tile when N affords it).
        while nb > 1 and (n + nb - 1) // nb < 4:
            nb = max(1, nb // 2)
        n_pad = _round_up(n, nb)
        x_in = _pad_axis(x_flat, 0, n_pad)     # zero rows -> gated zeros, sliced off
        footprint = 4 * nb * per_batch_bytes + invariant_bytes
        vmem_limit = int(min(64 << 20, max(footprint + (2 << 20), 16 << 20)))
        try:
            out_flat = _ese_single_pass(
                x_in, wt, b, nb=nb, hw=hw, vmem_limit=vmem_limit,
                single_buffer_weights=True)
        except Exception:
            # pipeline_mode=pl.Buffered(1) unsupported on this jax build:
            # retry with default (double-buffered) weight/bias tiles.
            out_flat = _ese_single_pass(
                x_in, wt, b, nb=nb, hw=hw, vmem_limit=vmem_limit,
                single_buffer_weights=False)
        out_flat = out_flat[:n, :, :hw]
    else:
        # ---- two passes: (C, HWp) slab too large for the VMEM budget -------
        # Gate is O(N*C^2) flops -- tiny -- leave it to plain XLA.
        pooled = jnp.mean(x.astype(jnp.float32), axis=(2, 3))            # (N, C)
        gate = jax.nn.sigmoid(pooled @ wt + b).astype(x.dtype)           # (N, C)
        thw = max(_LANE,
                  (_VMEM_BUDGET_BYTES // (4 * c * itemsize)) // _LANE * _LANE)
        thw = int(min(thw, hwp))
        hwp2 = _round_up(hwp, thw)
        x_in = _pad_axis(x_flat, 2, hwp2)
        footprint = 4 * c * thw * itemsize + c * itemsize
        vmem_limit = int(min(64 << 20, max(footprint + (2 << 20), 16 << 20)))
        out_flat = _ese_two_pass_scale(x_in, gate, thw=thw, vmem_limit=vmem_limit)
        out_flat = out_flat[:, :, :hw]

    return out_flat.reshape(n, c, h, w)


if __name__ == "__main__":
    key = jax.random.PRNGKey(0)
    k_x, k_w, k_b = jax.random.split(key, 3)

    N, C, H, W = 2, 4, 16, 16
    x = jax.random.normal(k_x, (N, C, H, W), dtype=jnp.float32)
    # Shapes from nn.Conv2d(C, C, kernel_size=1).
    weight = jax.random.normal(k_w, (C, C, 1, 1), dtype=jnp.float32) * 0.1
    bias = jax.random.normal(k_b, (C,), dtype=jnp.float32) * 0.1

    out = ese_module(x, weight, bias)
    out = jax.block_until_ready(out)

    # Plain-JAX reference for the same forward pass.
    avg = jnp.mean(x, axis=(2, 3))                       # (N, C)
    s = avg @ weight.reshape(C, C).T + bias              # (N, C)
    ref = x * jax.nn.sigmoid(s)[:, :, None, None]
    assert jnp.allclose(out, ref, atol=1e-5, rtol=1e-5), "mismatch vs reference"

    print("KERNEL_OK")
</pallas_src>

<mosaic_0001>
module attributes {stable_mosaic.version = 11 : i64} {
  func.func @_ese_fused_kernel(%arg0: i32, %arg1: memref<1x4x256xf32, #tpu.memory_space<vmem>>, %arg2: memref<4x4xf32, #tpu.memory_space<vmem>>, %arg3: memref<1x4xf32, #tpu.memory_space<vmem>>, %arg4: memref<1x4x256xf32, #tpu.memory_space<vmem>>) attributes {dimension_semantics = [#tpu.dimension_semantics<parallel>], iteration_bounds = array<i64: 2>, scalar_prefetch = 0 : i64, scratch_operands = 0 : i64, tpu.core_type = #tpu.core_type<tc>, window_params = [{transform_indices = @transform_0, window_bounds = array<i64: 1, 4, 256>}, {pipeline_mode = #tpu.pipeline_mode<synchronous>, transform_indices = @transform_1, window_bounds = array<i64: 4, 4>}, {pipeline_mode = #tpu.pipeline_mode<synchronous>, transform_indices = @transform_2, window_bounds = array<i64: 1, 4>}, {transform_indices = @transform_3, window_bounds = array<i64: 1, 4, 256>}]} {
    %c0 = arith.constant 0 : index
    %c0_0 = arith.constant 0 : index
    %c0_1 = arith.constant 0 : index
    %0 = vector.load %arg1[%c0, %c0_0, %c0_1] : memref<1x4x256xf32, #tpu.memory_space<vmem>>, vector<1x4x256xf32>
    %cst = arith.constant dense<0.000000e+00> : vector<1x4xf32>
    %1 = vector.multi_reduction <add>, %0, %cst [2] : vector<1x4x256xf32> to vector<1x4xf32>
    %cst_2 = arith.constant 3.906250e-03 : f32
    %2 = vector.broadcast %cst_2 : f32 to vector<1x4xf32>
    %3 = arith.mulf %1, %2 : vector<1x4xf32>
    %c0_3 = arith.constant 0 : index
    %c0_4 = arith.constant 0 : index
    %4 = vector.load %arg2[%c0_3, %c0_4] : memref<4x4xf32, #tpu.memory_space<vmem>>, vector<4x4xf32>
    %cst_5 = arith.constant dense<0.000000e+00> : vector<1x4xf32>
    %5 = tpu.matmul %3, %4, %cst_5 {dimension_numbers = #tpu.dot_dimension_numbers<[1], [0], [0], [1], [0, 0, 1, 1], [], []>} : vector<1x4xf32>, vector<4x4xf32>, vector<1x4xf32> -> vector<1x4xf32>
    %c0_6 = arith.constant 0 : index
    %c0_7 = arith.constant 0 : index
    %6 = vector.load %arg3[%c0_6, %c0_7] : memref<1x4xf32, #tpu.memory_space<vmem>>, vector<1x4xf32>
    %7 = arith.addf %5, %6 : vector<1x4xf32>
    %8 = arith.negf %7 : vector<1x4xf32>
    %9 = math.exp %8 : vector<1x4xf32>
    %cst_8 = arith.constant 1.000000e+00 : f32
    %10 = vector.broadcast %cst_8 : f32 to vector<1x4xf32>
    %11 = arith.addf %10, %9 : vector<1x4xf32>
    %12 = arith.divf %10, %11 : vector<1x4xf32>
    %13 = vector.shape_cast %12 : vector<1x4xf32> to vector<1x4x1xf32>
    %14 = vector.broadcast %13 : vector<1x4x1xf32> to vector<1x4x256xf32>
    %15 = arith.mulf %0, %14 : vector<1x4x256xf32>
    %c0_9 = arith.constant 0 : index
    %c0_10 = arith.constant 0 : index
    %c0_11 = arith.constant 0 : index
    %16 = vector.load %arg4[%c0_9, %c0_10, %c0_11] : memref<1x4x256xf32, #tpu.memory_space<vmem>>, vector<1x4x256xf32>
    tpu.vector_store %arg4[%c0_9, %c0_10, %c0_11], %15 {strides = array<i32>} : memref<1x4x256xf32, #tpu.memory_space<vmem>>, vector<1x4x256xf32>,
    return
  }
  func.func @transform_0(%arg0: i32) -> (i32, i32, i32) {
    %c0_i32 = arith.constant 0 : i32
    %c0_i32_0 = arith.constant 0 : i32
    %c0_i32_1 = arith.constant 0 : i32
    return %arg0, %c0_i32, %c0_i32_0 : i32, i32, i32
  }
  func.func @transform_1(%arg0: i32) -> (i32, i32) {
    %c0_i32 = arith.constant 0 : i32
    %c0_i32_0 = arith.constant 0 : i32
    %c0_i32_1 = arith.constant 0 : i32
    return %c0_i32, %c0_i32_0 : i32, i32
  }
  func.func @transform_2(%arg0: i32) -> (i32, i32) {
    %c0_i32 = arith.constant 0 : i32
    %c0_i32_0 = arith.constant 0 : i32
    %c0_i32_1 = arith.constant 0 : i32
    return %c0_i32, %c0_i32_0 : i32, i32
  }
  func.func @transform_3(%arg0: i32) -> (i32, i32, i32) {
    %c0_i32 = arith.constant 0 : i32
    %c0_i32_0 = arith.constant 0 : i32
    %c0_i32_1 = arith.constant 0 : i32
    return %arg0, %c0_i32, %c0_i32_0 : i32, i32, i32
  }
}

module attributes {stable_mosaic.version = 11 : i64} {
  func.func @_ese_fused_kernel(%arg0: i32, %arg1: memref<1x4x256xf32, #tpu.memory_space<vmem>>, %arg2: memref<4x4xf32, #tpu.memory_space<vmem>>, %arg3: memref<1x4xf32, #tpu.memory_space<vmem>>, %arg4: memref<1x4x256xf32, #tpu.memory_space<vmem>>) attributes {dimension_semantics = [#tpu.dimension_semantics<parallel>], iteration_bounds = array<i64: 2>, scalar_prefetch = 0 : i64, scratch_operands = 0 : i64, tpu.core_type = #tpu.core_type<tc>, window_params = [{transform_indices = @transform_0, window_bounds = array<i64: 1, 4, 256>}, {pipeline_mode = #tpu.pipeline_mode<synchronous>, transform_indices = @transform_1, window_bounds = array<i64: 4, 4>}, {pipeline_mode = #tpu.pipeline_mode<synchronous>, transform_indices = @transform_2, window_bounds = array<i64: 1, 4>}, {transform_indices = @transform_3, window_bounds = array<i64: 1, 4, 256>}]} {
    %c0 = arith.constant 0 : index
    %c0_0 = arith.constant 0 : index
    %c0_1 = arith.constant 0 : index
    %0 = vector.load %arg1[%c0, %c0_0, %c0_1] : memref<1x4x256xf32, #tpu.memory_space<vmem>>, vector<1x4x256xf32>
    %cst = arith.constant dense<0.000000e+00> : vector<1x4xf32>
    %1 = vector.multi_reduction <add>, %0, %cst [2] : vector<1x4x256xf32> to vector<1x4xf32>
    %cst_2 = arith.constant 3.906250e-03 : f32
    %2 = vector.broadcast %cst_2 : f32 to vector<1x4xf32>
    %3 = arith.mulf %1, %2 : vector<1x4xf32>
    %c0_3 = arith.constant 0 : index
    %c0_4 = arith.constant 0 : index
    %4 = vector.load %arg2[%c0_3, %c0_4] : memref<4x4xf32, #tpu.memory_space<vmem>>, vector<4x4xf32>
    %cst_5 = arith.constant dense<0.000000e+00> : vector<1x4xf32>
    %5 = tpu.matmul %3, %4, %cst_5 {dimension_numbers = #tpu.dot_dimension_numbers<[1], [0], [0], [1], [0, 0, 1, 1], [], []>} : vector<1x4xf32>, vector<4x4xf32>, vector<1x4xf32> -> vector<1x4xf32>
    %c0_6 = arith.constant 0 : index
    %c0_7 = arith.constant 0 : index
    %6 = vector.load %arg3[%c0_6, %c0_7] : memref<1x4xf32, #tpu.memory_space<vmem>>, vector<1x4xf32>
    %7 = arith.addf %5, %6 : vector<1x4xf32>
    %8 = arith.negf %7 : vector<1x4xf32>
    %9 = math.exp %8 : vector<1x4xf32>
    %cst_8 = arith.constant 1.000000e+00 : f32
    %10 = vector.broadcast %cst_8 : f32 to vector<1x4xf32>
    %11 = arith.addf %10, %9 : vector<1x4xf32>
    %12 = arith.divf %10, %11 : vector<1x4xf32>
    %13 = vector.shape_cast %12 : vector<1x4xf32> to vector<1x4x1xf32>
    %14 = vector.broadcast %13 : vector<1x4x1xf32> to vector<1x4x256xf32>
    %15 = arith.mulf %0, %14 : vector<1x4x256xf32>
    %c0_9 = arith.constant 0 : index
    %c0_10 = arith.constant 0 : index
    %c0_11 = arith.constant 0 : index
    %16 = vector.load %arg4[%c0_9, %c0_10, %c0_11] : memref<1x4x256xf32, #tpu.memory_space<vmem>>, vector<1x4x256xf32>
    tpu.vector_store %arg4[%c0_9, %c0_10, %c0_11], %15 {strides = array<i32>} : memref<1x4x256xf32, #tpu.memory_space<vmem>>, vector<1x4x256xf32>,
    return
  }
  func.func @transform_0(%arg0: i32) -> (i32, i32, i32) {
    %c0_i32 = arith.constant 0 : i32
    %c0_i32_0 = arith.constant 0 : i32
    %c0_i32_1 = arith.constant 0 : i32
    return %arg0, %c0_i32, %c0_i32_0 : i32, i32, i32
  }
  func.func @transform_1(%arg0: i32) -> (i32, i32) {
    %c0_i32 = arith.constant 0 : i32
    %c0_i32_0 = arith.constant 0 : i32
    %c0_i32_1 = arith.constant 0 : i32
    return %c0_i32, %c0_i32_0 : i32, i32
  }
  func.func @transform_2(%arg0: i32) -> (i32, i32) {
    %c0_i32 = arith.constant 0 : i32
    %c0_i32_0 = arith.constant 0 : i32
    %c0_i32_1 = arith.constant 0 : i32
    return %c0_i32, %c0_i32_0 : i32, i32
  }
  func.func @transform_3(%arg0: i32) -> (i32, i32, i32) {
    %c0_i32 = arith.constant 0 : i32
    %c0_i32_0 = arith.constant 0 : i32
    %c0_i32_1 = arith.constant 0 : i32
    return %arg0, %c0_i32, %c0_i32_0 : i32, i32, i32
  }
}

</mosaic_0001>

<bundles_post_ra>
// kernel: tpu_custom_call.1
= control target key start
LH: loop header
LB: loop body
LE: loop exit
PB: predicated region body
PF: predicated region fallthrough
CT: control target
= control target key end

     0   :  { %8 = vsyncpa [#allocation3], 0  ;;  %s831_s0 = inlined_call_operand.hbm [shape: f32[2,4,256], index: 0, kind: input, shape index: {}]   ;;  %s832_s1 = inlined_call_operand.hbm [shape: f32[4,4], index: 1, kind: input, shape index: {}]   ;;  %s833_s2 = inlined_call_operand.vmem [shape: f32[1,4], index: 2, kind: input, shape index: {}]   ;;  %s834_s3 = inlined_call_operand.hbm [shape: f32[2,4,256], index: 3, kind: output, shape index: {}]  }
   0x1   :  { %10 = vsyncpa [#allocation3 + $0x1], 0 }
   0x2   :  { %11 = vsyncpa [#allocation6], 0 }
   0x3   :  { %12 = vsyncpa [#allocation4], 0 }
   0x4   :  { %14 = vsyncpa [#allocation4 + $0x1], 0  ;;  %s658_s12 = smov 0   ;;  %s660_s13 = smov 0  }
   0x5   :  { %s662_s14 = smov 0   ;;  %s664_s15 = smov 0  }
   0x6 LB: > { %s679_s16 = sadd.s32 4294967295, %s630_s15   ;;  %s415_s17 = sadd.s32 4294967294, %s630_s15   ;;  %s630_s15 = sphi %s664_s15, %s857_s15   ;;  %s626_s14 = sphi %s662_s14, %s856_s14   ;;  %s622_s13 = sphi %s660_s13, %s855_s13   ;;  %s618_s12 = sphi %s658_s12, %s854_s12  }
   0x7   : > { %p40_p0 = scmp.ne.s32.totalorder %s622_s13, %s618_s12  ;;  %p835_p1 = scmp.eq.s32.totalorder %s679_s16, 0 }
   0x8   : > { %p112_p3 = scmp.eq.s32.totalorder %s415_s17, 1  ;;  %p416_p5 = scmp.ge.s32.totalorder %s630_s15, 1 }
   0x9   : > { %p688_p4 = por %p835_p1, %p40_p0  ;;  %p119_p7 = scmp.lt.s32.totalorder %s630_s15, 3 }
   0xa   : > { %p693_p6 = por %p112_p3, %p40_p0  ;;  %s632_s21 = smov [#allocation5]  }
   0xb   : > { %s839_s18 = scalar_select %p688_p4, 1, 0 }
   0xc   : > { %s840_s19 = scalar_select %p693_p6, 1, 0 }
   0xd   : > { %p698_p8 = pnand %p416_p5, %p119_p7  ;;  %s132_s22 = sshll.u32 %s632_s21, 4  ;;  %s133_s22 = int_to_ptr.vmem [resolvable:$true] %s132_s22 }
   0xe   : > { %s706_s23 = sadd.s32 1, %s630_s15   ;;  %s27_s27 = sadd.s32 1, %s626_s14 }
   0xf   : > { %s841_s20 = scalar_select %p698_p8, 1, 0 }
  0x10   : > { %p451_p10 = pneg %p698_p8  ;;  %s24_s25 = ssub.s32 %s630_s15, %s706_s23 }
  0x11   : > { %p716_p12 = scmp.eq.s32.totalorder %s24_s25, 0  ;;  %p34_p13 = scmp.ne.s32.totalorder %s626_s14, %s622_s13 }
  0x12   : > { %p710_p11 = pnand %p451_p10, %p835_p1  ;;  %s519_s28 = scalar_lea.vmem %s133_s22, 64 }
  0x13   : > { %p520_p3 = scmp.ne.s32.totalorder %s133_s22, %s519_s28  ;;  %p527_p9 = scmp.lt.s32.totalorder %s133_s22, %s133_s22 }
  0x14   : > { %p510_p0 = pneg %p710_p11  ;;  %p528_p2 = scmp.lt.s32.totalorder %s519_s28, %s519_s28 }
  0x16   : > { %p522_p5 = pnand %p520_p3, %p510_p0  ;;  %p529_p10 = por %p528_p2, %p527_p9 }
  0x18   : > { %p523_p7 = pneg %p522_p5 }
  0x1a   : > { %p530_p1 = pnand %p529_p10, %p523_p7 }
  0x1c   : > { %533 = shalt.err (!%p530_p1)
}
  0x1d   : > { %454 = dma.hbm_to_vmem [thread:$0]  (!%p710_p11), %s832_s1, 64, %s133_s22, [#allocation6]  }
  0x1e   : > { %s733_s4 = scalar_select %p716_p12, %s626_s14, %s27_s27  }
  0x1f   : > { %p35_p1 = scmp.eq.s32.totalorder %s630_s15, 0  ;;  %p844_p2 = scmp.eq.s32.totalorder %s679_s16, 1 }
  0x20   : > { %p464_p0 = scmp.lt.s32.totalorder %s630_s15, 2  ;;  %s146_s6 = sand.u32 1, %s626_s14  }
  0x21   : > { %p741_p9 = por %p844_p2, %p34_p13  ;;  %p36_p3 = por %p35_p1, %p34_p13 }
  0x22   : > { %s419_s7 = sshll.u32 %s146_s6, 3  ;;  %s434_s8 = sshll.u32 %s630_s15, 7 }
  0x23   : > { %s845_s5 = scalar_select %p741_p9, 1, 0 }
  0x24   : > { %s754_s11 = scalar_lea.hbm %s831_s0, %s434_s8  ;;  %s150_s17 = scalar_lea.vmem [#allocation2], %s419_s7 }
  0x25   : > { %s158_s21 = sshll.u32 %s150_s17, 4  ;;  %p756_p11 = pnand %p464_p0, %p36_p3  ;;  %s159_s21 = int_to_ptr.vmem [resolvable:$true] %s158_s21 }
  0x26   : > { %s147_s24 = scalar_lea.sflag [#allocation3], %s146_s6  ;;  %s534_s25 = scalar_lea.hbm %s754_s11, 128 }
  0x27   : > { %p535_p12 = scmp.ne.s32.totalorder %s754_s11, %s534_s25  ;;  %p536_p13 = pneg %p756_p11 }
  0x28   : > { %s539_s28 = scalar_lea.hbm %s831_s0, 256  ;;  %p540_p10 = scmp.lt.s32.totalorder %s754_s11, %s831_s0 }
  0x29   : > { %p537_p5 = pnand %p536_p13, %p535_p12  ;;  %p541_p1 = scmp.lt.s32.totalorder %s539_s28, %s534_s25 }
  0x2b   : > { %p538_p7 = pneg %p537_p5  ;;  %p542_p2 = por %p541_p1, %p540_p10 }
  0x2d   : > { %p543_p0 = pnand %p542_p2, %p538_p7 }
  0x2f   : > { %546 = shalt.err (!%p543_p0)
}
  0x30   : > { %s547_s7 = scalar_lea.vmem %s159_s21, 128  ;;  %s633_s6 = smov [#allocation2]  }
  0x31   : > { %p548_p3 = scmp.ne.s32.totalorder %s159_s21, %s547_s7  ;;  %s552_s8 = sshll.u32 %s633_s6, 4  ;;  %s553_s8 = int_to_ptr.vmem [resolvable:$false] %s552_s8 }
  0x32   : > { %s554_s9 = scalar_lea.vmem %s553_s8, 256  ;;  %p555_p12 = scmp.lt.s32.totalorder %s159_s21, %s553_s8 }
  0x33   : > { %p550_p6 = pnand %p548_p3, %p536_p13  ;;  %p556_p5 = scmp.lt.s32.totalorder %s554_s9, %s547_s7 }
  0x35   : > { %p551_p9 = pneg %p550_p6  ;;  %p557_p4 = por %p556_p5, %p555_p12 }
  0x37   : > { %p558_p8 = pnand %p557_p4, %p551_p9 }
  0x39   : > { %561 = shalt.err (!%p558_p8)
}
  0x3a   : > { %458 = dma.hbm_to_vmem [thread:$0]  (!%p756_p11), %s754_s11, 128, %s159_s21, %s147_s24  }
  0x3b   : > { %p847_p7 = scmp.ne.s32.totalorder %s841_s20, 0 }
  0x3c   : > { %s777_s10 = sand.u32 (!%p847_p7), 1, %s622_s13   ;;  %p848_p4 = scmp.ne.s32.totalorder (!%p847_p7), %s839_s18, 0 }
  0x3d   : > { %167 = sbr.rel (%p847_p7) target bundleno = 579 (0x243), region = 32  ;;  %s423_s17 = sshll.u32 (!%p847_p7), %s777_s10, 3 }
  0x3e   : > { %s170_s25 = scalar_lea.sflag (!%p847_p7), [#allocation3], %s777_s10  ;;  %s173_s26 = scalar_lea.vmem (!%p847_p7), [#allocation2], %s423_s17 }
  0x42   : > { %605 = dma.done.wait (%p848_p4), %s170_s25, 128  }
  0x43   : > { %607 = vsyncadd (%p848_p4), %s170_s25, 4294967168  ;;  %p849_p6 = scmp.eq.s32.totalorder %s679_s16, 0 }
  0x45   : > { %609 = dma.done.wait (%p849_p6), [#allocation6], 64   ;;  %p850_p8 = pmov %p849_p6 }
  0x46   : > { %vm204_vm0 = vcmask 1043456   ;;  %v200_v0 = vld [vmem:[%s173_s26] sm:$0xff]  ;;  %v634_v5 = vmov 0.0   ;;  %v211_v6 = vld [vmem:[#allocation5] sm:$0xf]  ;;  %vm635_vm1 = vmmov 0   ;;  %v214_v7 = vlaneseq }
  0x47   : > { %611 = vsyncadd (%p850_p8), [#allocation6], 4294967232  ;;  %v202_v1 = vcombine.high %v200_v0, %v200_v0  ;;  %v205_v2 = vsel %vm204_vm0, %v200_v0, 0.0  ;;  %438 = vmatprep.subr.mxu0 %v634_v5  ;;  %440 = vmatprep.mubr.msk.f32.mxu0 %vm635_vm1, %v634_v5  ;;  %vm220_vm2 = vcmask 31744   ;;  %v212_v14 = vld [vmem:[%s833_s2] sm:$0x1] }
  0x48   : > { %439 = vmatpush3.msk.msra.mxu0 %vm204_vm0, %v211_v6  ;;  %v215_v8 = vand.u32 127, %v214_v7  ;;  %v217_v9 = vshrl.u32 %v214_v7, 7  ;;  %v636_v24 = vmov 839922192   ;;  %s435_s11 = sshll.u32 %s679_s16, 7  ;;  %s199_s21 = scalar_lea.vmem [#allocation7], %s423_s17 }
  0x49   : > { %v206_v3 = vsel %vm204_vm0, %v202_v1, 0.0  ;;  %v311_v25 = vunpack.c.l.s4 %v636_v24  ;;  %s335_s22 = sshll.u32 %s199_s21, 4  ;;  %s333_s28 = scalar_lea.hbm %s834_s3, %s435_s11  ;;  %s336_s22 = int_to_ptr.vmem [resolvable:$true] %s335_s22 }
  0x4a   : > { %v207_v4 = vadd.f32 %v206_v3, %v205_v2  ;;  %v218_v10 = vsub.s32 %v215_v8, %v217_v9  ;;  %v304_v21 = vsub.s32 0, %v217_v9  ;;  %s321_s29 = scalar_lea.sflag [#allocation4], %s777_s10  ;;  %s562_s30 = scalar_lea.vmem %s336_s22, 128 }
  0x4b   : > { %v312_v26 = vunpack.c.0.s8 %v311_v25  ;;  %p563_p9 = scmp.ne.s32.totalorder %s336_s22, %s562_s30  ;;  %p851_p11 = scmp.ne.s32.totalorder %s845_s5, 0 }
  0x4c   : > { %208 = vadd.xlane.f32.xlu0 %v207_v4  ;;  %s637_s7 = smov [#allocation7]  }
  0x4d   : > { %v315_v27 = vsub.s32 %v312_v26, %v217_v9  ;;  %p564_p13 = pnand %p563_p9, %p851_p11  ;;  %s566_s6 = sshll.u32 %s637_s7, 4  ;;  %s567_s6 = int_to_ptr.vmem [resolvable:$false] %s566_s6 }
  0x4e   : > { %s568_s16 = scalar_lea.vmem %s567_s6, 256  ;;  %p569_p1 = scmp.lt.s32.totalorder %s336_s22, %s567_s6 }
  0x4f   : > { %p565_p10 = pneg %p564_p13  ;;  %p570_p2 = scmp.lt.s32.totalorder %s568_s16, %s562_s30 }
  0x51   : > { %p571_p0 = por %p570_p2, %p569_p1 }
  0x53   : > { %p572_p3 = pnand %p571_p0, %p565_p10 }
  0xd5   : > { %v209_v11 = vpop.xlane.xlu0 %208 }
  0xd6   : > { %v210_v12 = vmul.f32 0.00390625, %v209_v11 }
  0xd8   : > { %v219_v13 = vrot.slane %v210_v12, %v218_v10 }
  0xda   : > { %441 = vmatmul.mubr.msk.f32.vlgmr.msra.gmra.mxu0 %vm220_vm2, %v219_v13 }
 0x19a   : > { %v292_v15 = vpop.f32.mrf.mxu0 }
 0x19b   : > { %v293_v16 = vadd.f32 %v292_v15, %v212_v14 }
 0x19c   : > { %v442_v17 = vpop.f32.mrf.mxu0 }
 0x19d   : > { %v428_v18 = vmul.f32 -1.442695, %v293_v16 }
 0x19f   : > { %504 = vpow2.f32 %v428_v18 }
 0x1ac   : > { %v505_v19 = vpop.eup %504 }
 0x1ad   : > { %v299_v20 = vadd.f32 1.0, %v505_v19 }
 0x1af   : > { %506 = vrcp.f32 %v299_v20 }
 0x1bc   : > { %v507_v22 = vpop.eup %506 }
 0x1bd   : > { %v305_v23 = vrot.slane %v507_v22, %v304_v21 }
 0x1bf   : > { %307 = vbcast.lane.b32.xlu0 %v305_v23, 256 }
 0x231   : > { %v308_v28 = vpop.permute.xlu0 %307 }
 0x232   : > { %v316_v29 = vrot.slane %v308_v28, %v315_v27 }
 0x234   : > { %v318_v30 = vmul.f32 %v316_v29, %v200_v0 }
 0x236   : > { %319 = vst [vmem:[%s199_s21] sm:$0xff] %v318_v30 }
 0x237   : > { %575 = shalt.err (!%p572_p3)
}
 0x238   : > { %s576_s8 = scalar_lea.hbm %s333_s28, 128  ;;  %s580_s17 = scalar_lea.hbm %s834_s3, 256 }
 0x239   : > { %p577_p12 = scmp.ne.s32.totalorder %s333_s28, %s576_s8  ;;  %p581_p4 = scmp.lt.s32.totalorder %s333_s28, %s834_s3 }
 0x23a   : > { %p582_p6 = scmp.lt.s32.totalorder %s580_s17, %s576_s8 }
 0x23b   : > { %p578_p5 = pnand %p577_p12, %p851_p11 }
 0x23c   : > { %p583_p8 = por %p582_p6, %p581_p4 }
 0x23d   : > { %p579_p7 = pneg %p578_p5 }
 0x23f   : > { %p584_p9 = pnand %p583_p8, %p579_p7 }
 0x241   : > { %587 = shalt.err (!%p584_p9)
}
 0x242   : > { %449 = dma.vmem_to_hbm [thread:$0]  (%p851_p11), %s336_s22, 128, %s333_s28, %s321_s29  }
 0x243 PF: > { %s347_s18 = sand.u32 1, %s618_s12   ;;  %p852_p13 = scmp.ne.s32.totalorder %s840_s19, 0 }
 0x244   : > { %p853_p10 = scmp.ge.s32.totalorder %s630_s15, 2  ;;  %s348_s20 = scalar_lea.sflag [#allocation4], %s347_s18 }
 0x246   : > { %p460_p1 = pnand %p853_p10, %p852_p13 }
 0x248   : > { %p461_p2 = pneg %p460_p1 }
 0x24a   : > { %613 = dma.done.wait (%p461_p2), %s348_s20, 128  }
 0x24b   : > { %615 = vsyncadd (%p461_p2), %s348_s20, 4294967168  ;;  %p17_p0 = scmp.ge.s32.totalorder %s706_s23, 4   ;;  %s854_s12 = smov %s622_s13 }
 0x24c   : > { %s855_s13 = smov %s626_s14  ;;  %s856_s14 = smov %s733_s4 }
 0x24d   : > { %s857_s15 = smov %s706_s23  ;;  %19 = sbr.rel (!%p17_p0) target bundleno = 6 (0x6), region = 81 }
 0x252   :  { %353 = vsyncpa [#allocation3], 1 }
 0x253   :  { %355 = vsyncpa [#allocation3 + $0x1], 1 }
 0x254   :  { %356 = vsyncpa [#allocation6], 1 }
 0x255   :  { %357 = vsyncpa [#allocation4], 1 }
 0x256   :  { %359 = vsyncpa [#allocation4 + $0x1], 1 }

// kernel: tpu_custom_call.1
= control target key start
LH: loop header
LB: loop body
LE: loop exit
PB: predicated region body
PF: predicated region fallthrough
CT: control target
= control target key end

     0   :  { %8 = vsyncpa [#allocation3], 0  ;;  %s831_s0 = inlined_call_operand.hbm [shape: f32[2,4,256], index: 0, kind: input, shape index: {}]   ;;  %s832_s1 = inlined_call_operand.hbm [shape: f32[4,4], index: 1, kind: input, shape index: {}]   ;;  %s833_s2 = inlined_call_operand.vmem [shape: f32[1,4], index: 2, kind: input, shape index: {}]   ;;  %s834_s3 = inlined_call_operand.hbm [shape: f32[2,4,256], index: 3, kind: output, shape index: {}]  }
   0x1   :  { %10 = vsyncpa [#allocation3 + $0x1], 0 }
   0x2   :  { %11 = vsyncpa [#allocation6], 0 }
   0x3   :  { %12 = vsyncpa [#allocation4], 0 }
   0x4   :  { %14 = vsyncpa [#allocation4 + $0x1], 0  ;;  %s658_s12 = smov 0   ;;  %s660_s13 = smov 0  }
   0x5   :  { %s662_s14 = smov 0   ;;  %s664_s15 = smov 0  }
   0x6 LB: > { %s679_s16 = sadd.s32 4294967295, %s630_s15   ;;  %s415_s17 = sadd.s32 4294967294, %s630_s15   ;;  %s630_s15 = sphi %s664_s15, %s857_s15   ;;  %s626_s14 = sphi %s662_s14, %s856_s14   ;;  %s622_s13 = sphi %s660_s13, %s855_s13   ;;  %s618_s12 = sphi %s658_s12, %s854_s12  }
   0x7   : > { %p40_p0 = scmp.ne.s32.totalorder %s622_s13, %s618_s12  ;;  %p835_p1 = scmp.eq.s32.totalorder %s679_s16, 0 }
   0x8   : > { %p112_p3 = scmp.eq.s32.totalorder %s415_s17, 1  ;;  %p416_p5 = scmp.ge.s32.totalorder %s630_s15, 1 }
   0x9   : > { %p688_p4 = por %p835_p1, %p40_p0  ;;  %p119_p7 = scmp.lt.s32.totalorder %s630_s15, 3 }
   0xa   : > { %p693_p6 = por %p112_p3, %p40_p0  ;;  %s632_s21 = smov [#allocation5]  }
   0xb   : > { %s839_s18 = scalar_select %p688_p4, 1, 0 }
   0xc   : > { %s840_s19 = scalar_select %p693_p6, 1, 0 }
   0xd   : > { %p698_p8 = pnand %p416_p5, %p119_p7  ;;  %s132_s22 = sshll.u32 %s632_s21, 4  ;;  %s133_s22 = int_to_ptr.vmem [resolvable:$true] %s132_s22 }
   0xe   : > { %s706_s23 = sadd.s32 1, %s630_s15   ;;  %s27_s27 = sadd.s32 1, %s626_s14 }
   0xf   : > { %s841_s20 = scalar_select %p698_p8, 1, 0 }
  0x10   : > { %p451_p10 = pneg %p698_p8  ;;  %s24_s25 = ssub.s32 %s630_s15, %s706_s23 }
  0x11   : > { %p716_p12 = scmp.eq.s32.totalorder %s24_s25, 0  ;;  %p34_p13 = scmp.ne.s32.totalorder %s626_s14, %s622_s13 }
  0x12   : > { %p710_p11 = pnand %p451_p10, %p835_p1  ;;  %s519_s28 = scalar_lea.vmem %s133_s22, 64 }
  0x13   : > { %p520_p3 = scmp.ne.s32.totalorder %s133_s22, %s519_s28  ;;  %p527_p9 = scmp.lt.s32.totalorder %s133_s22, %s133_s22 }
  0x14   : > { %p510_p0 = pneg %p710_p11  ;;  %p528_p2 = scmp.lt.s32.totalorder %s519_s28, %s519_s28 }
  0x16   : > { %p522_p5 = pnand %p520_p3, %p510_p0  ;;  %p529_p10 = por %p528_p2, %p527_p9 }
  0x18   : > { %p523_p7 = pneg %p522_p5 }
  0x1a   : > { %p530_p1 = pnand %p529_p10, %p523_p7 }
  0x1c   : > { %533 = shalt.err (!%p530_p1)
}
  0x1d   : > { %454 = dma.hbm_to_vmem [thread:$0]  (!%p710_p11), %s832_s1, 64, %s133_s22, [#allocation6]  }
  0x1e   : > { %s733_s4 = scalar_select %p716_p12, %s626_s14, %s27_s27  }
  0x1f   : > { %p35_p1 = scmp.eq.s32.totalorder %s630_s15, 0  ;;  %p844_p2 = scmp.eq.s32.totalorder %s679_s16, 1 }
  0x20   : > { %p464_p0 = scmp.lt.s32.totalorder %s630_s15, 2  ;;  %s146_s6 = sand.u32 1, %s626_s14  }
  0x21   : > { %p741_p9 = por %p844_p2, %p34_p13  ;;  %p36_p3 = por %p35_p1, %p34_p13 }
  0x22   : > { %s419_s7 = sshll.u32 %s146_s6, 3  ;;  %s434_s8 = sshll.u32 %s630_s15, 7 }
  0x23   : > { %s845_s5 = scalar_select %p741_p9, 1, 0 }
  0x24   : > { %s754_s11 = scalar_lea.hbm %s831_s0, %s434_s8  ;;  %s150_s17 = scalar_lea.vmem [#allocation2], %s419_s7 }
  0x25   : > { %s158_s21 = sshll.u32 %s150_s17, 4  ;;  %p756_p11 = pnand %p464_p0, %p36_p3  ;;  %s159_s21 = int_to_ptr.vmem [resolvable:$true] %s158_s21 }
  0x26   : > { %s147_s24 = scalar_lea.sflag [#allocation3], %s146_s6  ;;  %s534_s25 = scalar_lea.hbm %s754_s11, 128 }
  0x27   : > { %p535_p12 = scmp.ne.s32.totalorder %s754_s11, %s534_s25  ;;  %p536_p13 = pneg %p756_p11 }
  0x28   : > { %s539_s28 = scalar_lea.hbm %s831_s0, 256  ;;  %p540_p10 = scmp.lt.s32.totalorder %s754_s11, %s831_s0 }
  0x29   : > { %p537_p5 = pnand %p536_p13, %p535_p12  ;;  %p541_p1 = scmp.lt.s32.totalorder %s539_s28, %s534_s25 }
  0x2b   : > { %p538_p7 = pneg %p537_p5  ;;  %p542_p2 = por %p541_p1, %p540_p10 }
  0x2d   : > { %p543_p0 = pnand %p542_p2, %p538_p7 }
  0x2f   : > { %546 = shalt.err (!%p543_p0)
}
  0x30   : > { %s547_s7 = scalar_lea.vmem %s159_s21, 128  ;;  %s633_s6 = smov [#allocation2]  }
  0x31   : > { %p548_p3 = scmp.ne.s32.totalorder %s159_s21, %s547_s7  ;;  %s552_s8 = sshll.u32 %s633_s6, 4  ;;  %s553_s8 = int_to_ptr.vmem [resolvable:$false] %s552_s8 }
  0x32   : > { %s554_s9 = scalar_lea.vmem %s553_s8, 256  ;;  %p555_p12 = scmp.lt.s32.totalorder %s159_s21, %s553_s8 }
  0x33   : > { %p550_p6 = pnand %p548_p3, %p536_p13  ;;  %p556_p5 = scmp.lt.s32.totalorder %s554_s9, %s547_s7 }
  0x35   : > { %p551_p9 = pneg %p550_p6  ;;  %p557_p4 = por %p556_p5, %p555_p12 }
  0x37   : > { %p558_p8 = pnand %p557_p4, %p551_p9 }
  0x39   : > { %561 = shalt.err (!%p558_p8)
}
  0x3a   : > { %458 = dma.hbm_to_vmem [thread:$0]  (!%p756_p11), %s754_s11, 128, %s159_s21, %s147_s24  }
  0x3b   : > { %p847_p7 = scmp.ne.s32.totalorder %s841_s20, 0 }
  0x3c   : > { %s777_s10 = sand.u32 (!%p847_p7), 1, %s622_s13   ;;  %p848_p4 = scmp.ne.s32.totalorder (!%p847_p7), %s839_s18, 0 }
  0x3d   : > { %167 = sbr.rel (%p847_p7) target bundleno = 579 (0x243), region = 32  ;;  %s423_s17 = sshll.u32 (!%p847_p7), %s777_s10, 3 }
  0x3e   : > { %s170_s25 = scalar_lea.sflag (!%p847_p7), [#allocation3], %s777_s10  ;;  %s173_s26 = scalar_lea.vmem (!%p847_p7), [#allocation2], %s423_s17 }
  0x42   : > { %605 = dma.done.wait (%p848_p4), %s170_s25, 128  }
  0x43   : > { %607 = vsyncadd (%p848_p4), %s170_s25, 4294967168  ;;  %p849_p6 = scmp.eq.s32.totalorder %s679_s16, 0 }
  0x45   : > { %609 = dma.done.wait (%p849_p6), [#allocation6], 64   ;;  %p850_p8 = pmov %p849_p6 }
  0x46   : > { %vm204_vm0 = vcmask 1043456   ;;  %v200_v0 = vld [vmem:[%s173_s26] sm:$0xff]  ;;  %v634_v5 = vmov 0.0   ;;  %v211_v6 = vld [vmem:[#allocation5] sm:$0xf]  ;;  %vm635_vm1 = vmmov 0   ;;  %v214_v7 = vlaneseq }
  0x47   : > { %611 = vsyncadd (%p850_p8), [#allocation6], 4294967232  ;;  %v202_v1 = vcombine.high %v200_v0, %v200_v0  ;;  %v205_v2 = vsel %vm204_vm0, %v200_v0, 0.0  ;;  %438 = vmatprep.subr.mxu0 %v634_v5  ;;  %440 = vmatprep.mubr.msk.f32.mxu0 %vm635_vm1, %v634_v5  ;;  %vm220_vm2 = vcmask 31744   ;;  %v212_v14 = vld [vmem:[%s833_s2] sm:$0x1] }
  0x48   : > { %439 = vmatpush3.msk.msra.mxu0 %vm204_vm0, %v211_v6  ;;  %v215_v8 = vand.u32 127, %v214_v7  ;;  %v217_v9 = vshrl.u32 %v214_v7, 7  ;;  %v636_v24 = vmov 839922192   ;;  %s435_s11 = sshll.u32 %s679_s16, 7  ;;  %s199_s21 = scalar_lea.vmem [#allocation7], %s423_s17 }
  0x49   : > { %v206_v3 = vsel %vm204_vm0, %v202_v1, 0.0  ;;  %v311_v25 = vunpack.c.l.s4 %v636_v24  ;;  %s335_s22 = sshll.u32 %s199_s21, 4  ;;  %s333_s28 = scalar_lea.hbm %s834_s3, %s435_s11  ;;  %s336_s22 = int_to_ptr.vmem [resolvable:$true] %s335_s22 }
  0x4a   : > { %v207_v4 = vadd.f32 %v206_v3, %v205_v2  ;;  %v218_v10 = vsub.s32 %v215_v8, %v217_v9  ;;  %v304_v21 = vsub.s32 0, %v217_v9  ;;  %s321_s29 = scalar_lea.sflag [#allocation4], %s777_s10  ;;  %s562_s30 = scalar_lea.vmem %s336_s22, 128 }
  0x4b   : > { %v312_v26 = vunpack.c.0.s8 %v311_v25  ;;  %p563_p9 = scmp.ne.s32.totalorder %s336_s22, %s562_s30  ;;  %p851_p11 = scmp.ne.s32.totalorder %s845_s5, 0 }
  0x4c   : > { %208 = vadd.xlane.f32.xlu0 %v207_v4  ;;  %s637_s7 = smov [#allocation7]  }
  0x4d   : > { %v315_v27 = vsub.s32 %v312_v26, %v217_v9  ;;  %p564_p13 = pnand %p563_p9, %p851_p11  ;;  %s566_s6 = sshll.u32 %s637_s7, 4  ;;  %s567_s6 = int_to_ptr.vmem [resolvable:$false] %s566_s6 }
  0x4e   : > { %s568_s16 = scalar_lea.vmem %s567_s6, 256  ;;  %p569_p1 = scmp.lt.s32.totalorder %s336_s22, %s567_s6 }
  0x4f   : > { %p565_p10 = pneg %p564_p13  ;;  %p570_p2 = scmp.lt.s32.totalorder %s568_s16, %s562_s30 }
  0x51   : > { %p571_p0 = por %p570_p2, %p569_p1 }
  0x53   : > { %p572_p3 = pnand %p571_p0, %p565_p10 }
  0xd5   : > { %v209_v11 = vpop.xlane.xlu0 %208 }
  0xd6   : > { %v210_v12 = vmul.f32 0.00390625, %v209_v11 }
  0xd8   : > { %v219_v13 = vrot.slane %v210_v12, %v218_v10 }
  0xda   : > { %441 = vmatmul.mubr.msk.f32.vlgmr.msra.gmra.mxu0 %vm220_vm2, %v219_v13 }
 0x19a   : > { %v292_v15 = vpop.f32.mrf.mxu0 }
 0x19b   : > { %v293_v16 = vadd.f32 %v292_v15, %v212_v14 }
 0x19c   : > { %v442_v17 = vpop.f32.mrf.mxu0 }
 0x19d   : > { %v428_v18 = vmul.f32 -1.442695, %v293_v16 }
 0x19f   : > { %504 = vpow2.f32 %v428_v18 }
 0x1ac   : > { %v505_v19 = vpop.eup %504 }
 0x1ad   : > { %v299_v20 = vadd.f32 1.0, %v505_v19 }
 0x1af   : > { %506 = vrcp.f32 %v299_v20 }
 0x1bc   : > { %v507_v22 = vpop.eup %506 }
 0x1bd   : > { %v305_v23 = vrot.slane %v507_v22, %v304_v21 }
 0x1bf   : > { %307 = vbcast.lane.b32.xlu0 %v305_v23, 256 }
 0x231   : > { %v308_v28 = vpop.permute.xlu0 %307 }
 0x232   : > { %v316_v29 = vrot.slane %v308_v28, %v315_v27 }
 0x234   : > { %v318_v30 = vmul.f32 %v316_v29, %v200_v0 }
 0x236   : > { %319 = vst [vmem:[%s199_s21] sm:$0xff] %v318_v30 }
 0x237   : > { %575 = shalt.err (!%p572_p3)
}
 0x238   : > { %s576_s8 = scalar_lea.hbm %s333_s28, 128  ;;  %s580_s17 = scalar_lea.hbm %s834_s3, 256 }
 0x239   : > { %p577_p12 = scmp.ne.s32.totalorder %s333_s28, %s576_s8  ;;  %p581_p4 = scmp.lt.s32.totalorder %s333_s28, %s834_s3 }
 0x23a   : > { %p582_p6 = scmp.lt.s32.totalorder %s580_s17, %s576_s8 }
 0x23b   : > { %p578_p5 = pnand %p577_p12, %p851_p11 }
 0x23c   : > { %p583_p8 = por %p582_p6, %p581_p4 }
 0x23d   : > { %p579_p7 = pneg %p578_p5 }
 0x23f   : > { %p584_p9 = pnand %p583_p8, %p579_p7 }
 0x241   : > { %587 = shalt.err (!%p584_p9)
}
 0x242   : > { %449 = dma.vmem_to_hbm [thread:$0]  (%p851_p11), %s336_s22, 128, %s333_s28, %s321_s29  }
 0x243 PF: > { %s347_s18 = sand.u32 1, %s618_s12   ;;  %p852_p13 = scmp.ne.s32.totalorder %s840_s19, 0 }
 0x244   : > { %p853_p10 = scmp.ge.s32.totalorder %s630_s15, 2  ;;  %s348_s20 = scalar_lea.sflag [#allocation4], %s347_s18 }
 0x246   : > { %p460_p1 = pnand %p853_p10, %p852_p13 }
 0x248   : > { %p461_p2 = pneg %p460_p1 }
 0x24a   : > { %613 = dma.done.wait (%p461_p2), %s348_s20, 128  }
 0x24b   : > { %615 = vsyncadd (%p461_p2), %s348_s20, 4294967168  ;;  %p17_p0 = scmp.ge.s32.totalorder %s706_s23, 4   ;;  %s854_s12 = smov %s622_s13 }
 0x24c   : > { %s855_s13 = smov %s626_s14  ;;  %s856_s14 = smov %s733_s4 }
 0x24d   : > { %s857_s15 = smov %s706_s23  ;;  %19 = sbr.rel (!%p17_p0) target bundleno = 6 (0x6), region = 81 }
 0x252   :  { %353 = vsyncpa [#allocation3], 1 }
 0x253   :  { %355 = vsyncpa [#allocation3 + $0x1], 1 }
 0x254   :  { %356 = vsyncpa [#allocation6], 1 }
 0x255   :  { %357 = vsyncpa [#allocation4], 1 }
 0x256   :  { %359 = vsyncpa [#allocation4 + $0x1], 1 }

</bundles_post_ra>
